<compile_context>
chip_gen: v7x
topology: tpu7x:2x2x1
jax: 0.10.0
libtpu: 0.0.40
codegen_flags: <defaults>
</compile_context>

<pallas_src>
import jax
import jax.numpy as jnp
from jax.experimental import pallas as pl
from jax.experimental.pallas import tpu as pltpu

_LANES = 128                      # vreg lane width
_SUBLANES = 8                     # vreg sublane height (f32)
_MAX_BLOCK_BYTES = 4 * 1024 * 1024   # ~4 MiB per block
_SPLIT_BYTES = 1 * 1024 * 1024       # force >=2 grid steps above this (v7x 2 TCs)
_VMEM_LIMIT = 32 * 1024 * 1024       # in+out double-buffered at 4 MiB blocks = 16 MiB


def _sigmoid_kernel(x_ref, o_ref):
    # x_ref / o_ref: (row_tile, 128) lane-dense blocks in VMEM.
    x = x_ref[...].astype(jnp.float32)
    # exp and the approximate reciprocal both execute on the EUP slot,
    # leaving the VALU free (perf-neutral for this HBM-bound op, but cheap).
    o_ref[...] = pl.reciprocal(1.0 + jnp.exp(-x), approx=True).astype(o_ref.dtype)


def _round_down(v, m):
    return (v // m) * m


def _round_up(v, m):
    return ((v + m - 1) // m) * m


def _choose_row_tile(rows, itemsize):
    """Pick a row tile: big blocks (~4 MiB), but >=2 grid steps for big slabs."""
    bytes_per_row = _LANES * itemsize
    cap = max(_SUBLANES, _round_down(_MAX_BLOCK_BYTES // bytes_per_row, _SUBLANES))
    if rows * bytes_per_row > _SPLIT_BYTES:
        # Guarantee at least two grid steps so the "parallel" axis can be
        # sharded across v7x's two TensorCores (no-op on v5e/v6e).
        cap = min(cap, _round_up(pl.cdiv(rows, 2), _SUBLANES))
    if rows <= _SUBLANES:
        return rows  # full-extent block; allowed even if not a multiple of 8
    return max(_SUBLANES, _round_down(min(rows, cap), _SUBLANES))


def _sigmoid_2d(x2d):
    rows = x2d.shape[0]
    tile = _choose_row_tile(rows, jnp.dtype(x2d.dtype).itemsize)
    grid = (pl.cdiv(rows, tile),)
    return pl.pallas_call(
        _sigmoid_kernel,
        out_shape=jax.ShapeDtypeStruct((rows, _LANES), x2d.dtype),
        grid_spec=pltpu.PrefetchScalarGridSpec(
            num_scalar_prefetch=0,
            grid=grid,
            in_specs=[pl.BlockSpec((tile, _LANES), lambda i: (i, 0))],
            out_specs=pl.BlockSpec((tile, _LANES), lambda i: (i, 0)),
        ),
        compiler_params=pltpu.CompilerParams(
            dimension_semantics=("parallel",),
            vmem_limit_bytes=_VMEM_LIMIT,
        ),
    )(x2d)


def nlanet_forward_pallas(x):
    """Elementwise sigmoid of `x` (any shape), matching NLANet.forward."""
    orig_shape = x.shape
    total = int(x.size)

    if total == 0:
        return x
    if total < _LANES:
        # Tiny input: not worth a kernel launch.
        return jax.nn.sigmoid(x)

    if total % _LANES == 0:
        # Fast path: no padding, no slicing.
        x2d = x.reshape(total // _LANES, _LANES)
        return _sigmoid_2d(x2d).reshape(orig_shape)

    # Unaligned case: kernel on the 128-aligned prefix, plain-JAX sigmoid on
    # the tiny (<128 elem) tail.  No full-array zero-pad is materialized.
    main = (total // _LANES) * _LANES
    flat = x.reshape(-1)
    out_main = _sigmoid_2d(flat[:main].reshape(main // _LANES, _LANES)).reshape(-1)
    out_tail = jax.nn.sigmoid(flat[main:])
    return jnp.concatenate([out_main, out_tail]).reshape(orig_shape)


if __name__ == "__main__":
    key = jax.random.PRNGKey(0)
    # Small shape consistent with an elementwise activation module.
    x = jax.random.normal(key, (2, 4, 16, 16), dtype=jnp.float32)

    out = jax.block_until_ready(nlanet_forward_pallas(x))

    # Reference: plain-JAX sigmoid (same semantics as torch.nn.Sigmoid).
    ref = jax.nn.sigmoid(x)

    assert out.shape == x.shape, out.shape
    assert out.dtype == x.dtype, out.dtype
    # Tolerance accounts for the EUP approximate reciprocal used in-kernel.
    max_err = float(jnp.max(jnp.abs(out - ref)))
    assert max_err < 5e-3, max_err

    print("KERNEL_OK")
</pallas_src>

<mosaic_0001>
module attributes {stable_mosaic.version = 11 : i64} {
  func.func @_sigmoid_kernel(%arg0: i32, %arg1: memref<16x128xf32, #tpu.memory_space<vmem>>, %arg2: memref<16x128xf32, #tpu.memory_space<vmem>>) attributes {dimension_semantics = [#tpu.dimension_semantics<parallel>], iteration_bounds = array<i64: 1>, scalar_prefetch = 0 : i64, scratch_operands = 0 : i64, tpu.core_type = #tpu.core_type<tc>, window_params = [{transform_indices = @transform_0, window_bounds = array<i64: 16, 128>}, {transform_indices = @transform_1, window_bounds = array<i64: 16, 128>}]} {
    %c0 = arith.constant 0 : index
    %c0_0 = arith.constant 0 : index
    %0 = vector.load %arg1[%c0, %c0_0] : memref<16x128xf32, #tpu.memory_space<vmem>>, vector<16x128xf32>
    %cst = arith.constant 0.000000e+00 : f32
    %1 = vector.broadcast %cst : f32 to vector<16x128xf32>
    %2 = arith.subf %1, %0 : vector<16x128xf32>
    %3 = math.exp %2 : vector<16x128xf32>
    %cst_1 = arith.constant 1.000000e+00 : f32
    %4 = vector.broadcast %cst_1 : f32 to vector<16x128xf32>
    %5 = arith.addf %4, %3 : vector<16x128xf32>
    %6 = tpu.reciprocal %5 {approx = true} : vector<16x128xf32> -> vector<16x128xf32>
    %c0_2 = arith.constant 0 : index
    %c0_3 = arith.constant 0 : index
    %7 = vector.load %arg2[%c0_2, %c0_3] : memref<16x128xf32, #tpu.memory_space<vmem>>, vector<16x128xf32>
    tpu.vector_store %arg2[%c0_2, %c0_3], %6 {strides = array<i32>} : memref<16x128xf32, #tpu.memory_space<vmem>>, vector<16x128xf32>,
    return
  }
  func.func @transform_0(%arg0: i32) -> (i32, i32) {
    %c0_i32 = arith.constant 0 : i32
    %c0_i32_0 = arith.constant 0 : i32
    return %arg0, %c0_i32 : i32, i32
  }
  func.func @transform_1(%arg0: i32) -> (i32, i32) {
    %c0_i32 = arith.constant 0 : i32
    %c0_i32_0 = arith.constant 0 : i32
    return %arg0, %c0_i32 : i32, i32
  }
}

</mosaic_0001>

<bundles_post_ra>
// kernel: tpu_custom_call.1
= control target key start
LH: loop header
LB: loop body
LE: loop exit
PB: predicated region body
PF: predicated region fallthrough
CT: control target
= control target key end

     0   :  { %6 = vsyncpa [#allocation3], 0  ;;  %s158_s0 = inlined_call_operand.hbm [shape: f32[16,128], index: 0, kind: input, shape index: {}]   ;;  %s159_s1 = inlined_call_operand.hbm [shape: f32[16,128], index: 1, kind: output, shape index: {}]  }
   0x1   :  { %7 = vsyncpa [#allocation4], 0  ;;  %s114_s6 = smov [#allocation2]   ;;  %s66_s10 = scalar_lea.hbm %s158_s0, 256 }
   0x2   :  { %s13_s7 = sshll.u32 %s114_s6, 4  ;;  %p67_p0 = scmp.ne.s32.totalorder %s158_s0, %s66_s10  ;;  %s14_s7 = int_to_ptr.vmem [resolvable:$true] %s13_s7 }
   0x3   :  { %p70_p1 = scmp.lt.u32.totalorder %s66_s10, %s158_s0 }
   0x5   :  { %p72_p2 = pnand %p70_p1, %p67_p0 }
   0x7   :  { %75 = shalt.err (!%p72_p2)
}
   0x8   :  { %s76_s15 = scalar_lea.vmem %s14_s7, 256  ;;  %p81_p4 = scmp.lt.s32.totalorder %s14_s7, %s14_s7 }
   0x9   :  { %p77_p3 = scmp.ne.s32.totalorder %s14_s7, %s76_s15  ;;  %p82_p5 = scmp.lt.s32.totalorder %s76_s15, %s76_s15 }
   0xb   :  { %p83_p6 = por %p82_p5, %p81_p4 }
   0xd   :  { %p84_p7 = pnand %p83_p6, %p77_p3 }
   0xf   :  { %87 = shalt.err (!%p84_p7)
}
  0x10   :  { %s115_s16 = smov 128   ;;  %s116_s17 = smov 8  }
  0x11   :  { %19 = dma.hbm_to_vmem [thread:$0]  %s158_s0, 256, %s14_s7, [#allocation3], %s115_s16, %s115_s16, %s116_s17  }
  0x12   :  { %110 = dma.done.wait [#allocation3], 256  }
  0x13   :  { %111 = vsyncadd [#allocation3], 4294967040  ;;  %v23_v0 = vld [vmem:[#allocation2] sm:$0xff]  ;;  %v24_v1 = vld [vmem:[#allocation2 + $0x8] sm:$0xff]  ;;  %s117_s20 = smov [#allocation5]  }
  0x14   :  { %v25_v2 = vsub.f32 0.0, %v23_v0  ;;  %v26_v3 = vsub.f32 0.0, %v24_v1  ;;  %s42_s21 = sshll.u32 %s117_s20, 4  ;;  %s43_s21 = int_to_ptr.vmem [resolvable:$true] %s42_s21 }
  0x15   :  { %s88_s0 = scalar_lea.vmem %s43_s21, 256  ;;  %p93_p9 = scmp.lt.s32.totalorder %s43_s21, %s43_s21 }
  0x16   :  { %v27_v4 = vmul.f32 1.442695, %v25_v2  ;;  %v29_v5 = vmul.f32 1.442695, %v26_v3  ;;  %p89_p8 = scmp.ne.s32.totalorder %s43_s21, %s88_s0  ;;  %p94_p10 = scmp.lt.s32.totalorder %s88_s0, %s88_s0 }
  0x18   :  { %58 = vpow2.f32 %v27_v4  ;;  %p95_p11 = por %p94_p10, %p93_p9 }
  0x19   :  { %60 = vpow2.f32 %v29_v5 }
  0x1a   :  { %p96_p12 = pnand %p95_p11, %p89_p8 }
  0x22   :  { %v59_v6 = vpop.eup %58 }
  0x23   :  { %v61_v7 = vpop.eup %60  ;;  %v31_v8 = vadd.f32 1.0, %v59_v6 }
  0x24   :  { %v32_v9 = vadd.f32 1.0, %v61_v7 }
  0x25   :  { %62 = vrcp.f32 %v31_v8 }
  0x26   :  { %64 = vrcp.f32 %v32_v9 }
  0x2f   :  { %v63_v10 = vpop.eup %62 }
  0x30   :  { %v65_v11 = vpop.eup %64  ;;  %35 = vst [vmem:[#allocation5] sm:$0xff] %v63_v10 }
  0x31   :  { %36 = vst [vmem:[#allocation5 + $0x8] sm:$0xff] %v65_v11 }
  0x32   :  { %99 = shalt.err (!%p96_p12)
}
  0x33   :  { %s100_s24 = scalar_lea.hbm %s159_s1, 256 }
  0x34   :  { %p101_p13 = scmp.ne.s32.totalorder %s159_s1, %s100_s24  ;;  %p104_p0 = scmp.lt.u32.totalorder %s100_s24, %s159_s1 }
  0x36   :  { %p106_p1 = pnand %p104_p0, %p101_p13 }
  0x38   :  { %109 = shalt.err (!%p106_p1)
}
  0x39   :  { %48 = dma.vmem_to_hbm [thread:$0]  %s43_s21, 256, %s159_s1, [#allocation4], %s115_s16, %s115_s16, %s116_s17  }
  0x3a   :  { %112 = dma.done.wait [#allocation4], 256  }
  0x3b   :  { %113 = vsyncadd [#allocation4], 4294967040 }
  0x3c   :  { %52 = vsyncpa [#allocation3], 1 }
  0x3d   :  { %53 = vsyncpa [#allocation4], 1 }

</bundles_post_ra>
